<compile_context>
chip_gen: v7x
topology: tpu7x:2x2x1
jax: 0.10.0
libtpu: 0.0.40
codegen_flags: <defaults>
</compile_context>

<pallas_src>
import functools
import math

import jax
import jax.numpy as jnp
from jax.experimental import pallas as pl
from jax.experimental.pallas import tpu as pltpu


def _round_up(x, m):
    return ((x + m - 1) // m) * m


def _device_kind():
    try:
        return jax.devices()[0].device_kind.lower()
    except Exception:
        return ""


def _feature_align():
    kind = _device_kind()
    # v6e / v7x MXUs are 2x256x256 -> 256-aligned K/N fills them.
    # v5e (4x128x128) and older parts only need 128.
    return 256 if ("v6" in kind or "v7" in kind) else 128


def _vmem_limit_cap_bytes():
    kind = _device_kind()
    # v7x has 64 MiB VMEM per TensorCore -> leave headroom for compiler scratch;
    # 128 MiB parts (v5e/v6e) can go much higher.
    return (56 if "v7" in kind else 100) * 1024 * 1024


def _choose_row_tile(n, tile_m, align_m=16):
    """Pick a row tile (multiple of 16 for bf16 sublane packing) that minimises
    row padding and, when cheap, yields >=2 row blocks (v7x has 2 TensorCores)."""
    n_align = _round_up(max(n, 1), align_m)
    tile_m = max(align_m, _round_up(tile_m, align_m))
    if n_align <= tile_m:
        # Small problem: one block, or split into 2 padding-free blocks for v7x.
        half = n_align // 2
        if n_align >= 2 * align_m and half % align_m == 0:
            return half
        return n_align
    # Large problem: search [tile_m/2, tile_m] for minimal padded rows.
    best, best_key = None, None
    for tm in range(tile_m // 2, tile_m + 1, align_m):
        waste = _round_up(n_align, tm) - n_align
        key = (waste, -tm)
        if best_key is None or key < best_key:
            best_key, best = key, tm
    return best


def _choose_hidden_chunk(h_pad, hidden_chunk, align):
    """Largest multiple of 128 dividing h_pad that is <= hidden_chunk,
    preferring multiples of the MXU-friendly alignment."""
    limit = max(hidden_chunk, 128)
    divisors = [c for c in range(128, h_pad + 1, 128)
                if h_pad % c == 0 and c <= limit]
    if not divisors:
        return h_pad
    aligned = [c for c in divisors if c % align == 0]
    return max(aligned) if aligned else max(divisors)


def _ffn_kernel(x_ref, w1_ref, b1_ref, w2_ref, b2_ref, o_ref, acc_ref):
    # x_ref : (TM, Dp)  native dtype          w1_ref: (Dp, TH) bf16
    # b1_ref: (1, TH)   f32                   w2_ref: (TH, Dp) bf16
    # b2_ref: (1, Dp)   f32                   o_ref : (TM, Dp) out dtype
    # acc_ref: (TM, Dp) f32 scratch (accumulator across hidden chunks)
    k = pl.program_id(1)

    @pl.when(k == 0)
    def _init():
        acc_ref[...] = jnp.zeros_like(acc_ref)

    xb = x_ref[...].astype(w1_ref.dtype)                      # cast in-register
    h = jnp.dot(xb, w1_ref[...], preferred_element_type=jnp.float32)
    h = jax.nn.sigmoid(h + b1_ref[...])                       # bias + sigmoid in f32 (EUP)
    # dropout (eval mode) == identity
    acc_ref[...] += jnp.dot(h.astype(w2_ref.dtype), w2_ref[...],
                            preferred_element_type=jnp.float32)

    @pl.when(k == pl.num_programs(1) - 1)
    def _finalize():
        o_ref[...] = (acc_ref[...] + b2_ref[...]).astype(o_ref.dtype)


def prepare_ffn_params(w1, b1, w2, b2, *, compute_dtype=jnp.bfloat16,
                       feature_align=None):
    """Pad + cast the weights ONCE (hoisted out of the per-call forward path).

    w1: [d_model, hidden] (in, out); w2: [hidden, d_model]; b1: [hidden]; b2: [d_model].
    """
    d_model, hidden = w1.shape
    align = _feature_align() if feature_align is None else feature_align
    d_pad = _round_up(d_model, align)
    h_pad = _round_up(hidden, align)

    w1p = jnp.pad(w1, ((0, d_pad - d_model), (0, h_pad - hidden))).astype(compute_dtype)
    w2p = jnp.pad(w2, ((0, h_pad - hidden), (0, d_pad - d_model))).astype(compute_dtype)
    b1p = jnp.pad(b1.reshape(1, hidden), ((0, 0), (0, h_pad - hidden))).astype(jnp.float32)
    b2p = jnp.pad(b2.reshape(1, d_model), ((0, 0), (0, d_pad - d_model))).astype(jnp.float32)
    return w1p, b1p, w2p, b2p


def _block_spec(shape, index_map, single_buffer=False):
    if single_buffer:
        # Constant index_map -> one VMEM buffer is enough (halves its footprint).
        return pl.BlockSpec(shape, index_map, pipeline_mode=pl.Buffered(1))
    return pl.BlockSpec(shape, index_map)


@functools.partial(jax.jit, static_argnames=("tile_m", "hidden_chunk", "out_dtype"))
def _ffn_forward(x, w1p, b1p, w2p, b2p, *, tile_m=512, hidden_chunk=512,
                 out_dtype=None):
    *lead, d_model = x.shape
    n = math.prod(lead) if lead else 1
    d_pad, h_pad = w1p.shape
    out_dtype = x.dtype if out_dtype is None else out_dtype

    align = _feature_align()
    th = _choose_hidden_chunk(h_pad, hidden_chunk, align)
    tm = _choose_row_tile(n, tile_m)
    n_pad = _round_up(max(n, 1), tm)

    x2 = x.reshape(n, d_model)
    if n_pad != n or d_pad != d_model:
        # Zero padding keeps the math exact for the real slice; x stays in its
        # native dtype (cast to bf16 happens in-register inside the kernel).
        x2 = jnp.pad(x2, ((0, n_pad - n), (0, d_pad - d_model)))

    num_row_blocks = n_pad // tm
    num_h_blocks = h_pad // th
    weights_resident = (num_h_blocks == 1)
    grid = (num_row_blocks, num_h_blocks)

    x_item = jnp.dtype(x.dtype).itemsize
    w_item = jnp.dtype(w1p.dtype).itemsize
    o_item = jnp.dtype(out_dtype).itemsize

    # VMEM footprint (bytes) -> derive vmem_limit, capped per TPU generation.
    w_bufs = 1 if weights_resident else 2
    vmem_need = (
        2 * tm * d_pad * x_item              # x, double-buffered
        + w_bufs * d_pad * th * w_item       # W1 chunk(s)
        + w_bufs * th * d_pad * w_item       # W2 chunk(s)
        + w_bufs * 8 * th * 4                # b1 (sublane-padded)
        + 8 * d_pad * 4                      # b2 (single buffer)
        + 2 * tm * d_pad * o_item            # out, double-buffered
        + tm * d_pad * 4                     # f32 accumulator scratch
        + tm * th * (4 + w_item)             # live intermediate (f32 + bf16 recast)
    )
    vmem_limit = int(min(max(2 * vmem_need, 32 * 1024 * 1024), _vmem_limit_cap_bytes()))

    cost = pl.CostEstimate(
        flops=2 * 2 * n_pad * d_pad * h_pad,                     # two matmuls
        transcendentals=n_pad * h_pad,                           # sigmoid
        bytes_accessed=(n_pad * d_pad * x_item                   # x
                        + num_row_blocks * (d_pad * h_pad + h_pad * d_pad) * w_item
                        + (h_pad + d_pad) * 4                    # biases
                        + n_pad * d_pad * o_item),               # out
    )

    out2 = pl.pallas_call(
        _ffn_kernel,
        out_shape=jax.ShapeDtypeStruct((n_pad, d_pad), out_dtype),
        grid_spec=pltpu.PrefetchScalarGridSpec(
            num_scalar_prefetch=0,
            grid=grid,
            in_specs=[
                _block_spec((tm, d_pad), lambda i, k: (i, 0)),                       # x rows
                _block_spec((d_pad, th), lambda i, k: (0, k), weights_resident),     # W1 chunk
                _block_spec((1, th), lambda i, k: (0, k), weights_resident),         # b1 chunk
                _block_spec((th, d_pad), lambda i, k: (k, 0), weights_resident),     # W2 chunk
                _block_spec((1, d_pad), lambda i, k: (0, 0), True),                  # b2 (resident)
            ],
            out_specs=pl.BlockSpec((tm, d_pad), lambda i, k: (i, 0)),
            scratch_shapes=[pltpu.VMEM((tm, d_pad), jnp.float32)],
        ),
        compiler_params=pltpu.CompilerParams(
            dimension_semantics=("parallel", "arbitrary"),
            vmem_limit_bytes=vmem_limit,
        ),
        cost_estimate=cost,
    )(x2, w1p, b1p, w2p, b2p)

    return out2[:n, :d_model].reshape(x.shape)


def positionwise_feed_forward(x, params, *, tile_m=512, hidden_chunk=512,
                              out_dtype=None):
    """x: [..., d_model]; params from prepare_ffn_params()."""
    w1p, b1p, w2p, b2p = params
    return _ffn_forward(x, w1p, b1p, w2p, b2p, tile_m=tile_m,
                        hidden_chunk=hidden_chunk, out_dtype=out_dtype)


def _init_linear_params(key, in_features, out_features, dtype=jnp.float32):
    # Deterministic init mimicking nn.Linear default: U(-1/sqrt(in), 1/sqrt(in)).
    kw, kb = jax.random.split(key)
    bound = 1.0 / (in_features ** 0.5)
    # Stored as [in, out] (transposed vs PyTorch's [out, in]) for row-major matmul.
    w = jax.random.uniform(kw, (in_features, out_features), dtype,
                           minval=-bound, maxval=bound)
    b = jax.random.uniform(kb, (out_features,), dtype,
                           minval=-bound, maxval=bound)
    return w, b


if __name__ == "__main__":
    d_model, hidden = 32, 64
    batch, seq = 2, 8

    key = jax.random.PRNGKey(0)
    kx, k1, k2 = jax.random.split(key, 3)

    x = jax.random.normal(kx, (batch, seq, d_model), jnp.float32)
    w1, b1 = _init_linear_params(k1, d_model, hidden)
    w2, b2 = _init_linear_params(k2, hidden, d_model)

    # Pad / cast the weights once, outside the per-call forward path.
    params = prepare_ffn_params(w1, b1, w2, b2)

    out = positionwise_feed_forward(x, params)
    out = jax.block_until_ready(out)
    assert out.shape == (batch, seq, d_model)

    # Reference 1: same bf16-input / f32-accumulate recipe as the kernel (tight check).
    xb = x.reshape(batch * seq, d_model).astype(jnp.bfloat16)
    hb = jax.nn.sigmoid(
        jnp.dot(xb, w1.astype(jnp.bfloat16), preferred_element_type=jnp.float32) + b1)
    ref_bf16 = (jnp.dot(hb.astype(jnp.bfloat16), w2.astype(jnp.bfloat16),
                        preferred_element_type=jnp.float32) + b2)
    ref_bf16 = ref_bf16.reshape(batch, seq, d_model)
    assert jnp.allclose(out, ref_bf16, atol=2e-3, rtol=2e-3)

    # Reference 2: pure f32 math (loose check — bf16 MXU inputs).
    ref_f32 = jax.nn.sigmoid(x @ w1 + b1) @ w2 + b2
    assert jnp.allclose(out, ref_f32, atol=5e-2, rtol=5e-2)

    print("KERNEL_OK")
</pallas_src>

<mosaic_0001>
module attributes {stable_mosaic.version = 11 : i64} {
  func.func @_ffn_kernel(%arg0: i32, %arg1: i32, %arg2: memref<16x128xf32, #tpu.memory_space<vmem>>, %arg3: memref<128x128xbf16, #tpu.memory_space<vmem>>, %arg4: memref<1x128xf32, #tpu.memory_space<vmem>>, %arg5: memref<128x128xbf16, #tpu.memory_space<vmem>>, %arg6: memref<1x128xf32, #tpu.memory_space<vmem>>, %arg7: memref<16x128xf32, #tpu.memory_space<vmem>>, %arg8: memref<16x128xf32, #tpu.memory_space<vmem>>) attributes {dimension_semantics = [#tpu.dimension_semantics<parallel>, #tpu.dimension_semantics<arbitrary>], iteration_bounds = array<i64: 1, 1>, scalar_prefetch = 0 : i64, scratch_operands = 1 : i64, tpu.core_type = #tpu.core_type<tc>, window_params = [{transform_indices = @transform_0, window_bounds = array<i64: 16, 128>}, {pipeline_mode = #tpu.pipeline_mode<synchronous>, transform_indices = @transform_1, window_bounds = array<i64: 128, 128>}, {pipeline_mode = #tpu.pipeline_mode<synchronous>, transform_indices = @transform_2, window_bounds = array<i64: 1, 128>}, {pipeline_mode = #tpu.pipeline_mode<synchronous>, transform_indices = @transform_3, window_bounds = array<i64: 128, 128>}, {pipeline_mode = #tpu.pipeline_mode<synchronous>, transform_indices = @transform_4, window_bounds = array<i64: 1, 128>}, {transform_indices = @transform_5, window_bounds = array<i64: 16, 128>}]} {
    %c0_i32 = arith.constant 0 : i32
    %0 = arith.cmpi eq, %arg1, %c0_i32 : i32
    %1 = arith.extui %0 : i1 to i32
    %c0_i32_0 = arith.constant 0 : i32
    %2 = arith.cmpi ne, %1, %c0_i32_0 : i32
    scf.if %2 {
      %cst_16 = arith.constant 0.000000e+00 : f32
      %24 = vector.broadcast %cst_16 : f32 to vector<16x128xf32>
      %c0_17 = arith.constant 0 : index
      %c0_18 = arith.constant 0 : index
      %25 = vector.load %arg8[%c0_17, %c0_18] : memref<16x128xf32, #tpu.memory_space<vmem>>, vector<16x128xf32>
      tpu.vector_store %arg8[%c0_17, %c0_18], %24 {strides = array<i32>} : memref<16x128xf32, #tpu.memory_space<vmem>>, vector<16x128xf32>,
    } else {
    }
    %c0 = arith.constant 0 : index
    %c0_1 = arith.constant 0 : index
    %3 = vector.load %arg2[%c0, %c0_1] : memref<16x128xf32, #tpu.memory_space<vmem>>, vector<16x128xf32>
    %4 = arith.truncf %3 : vector<16x128xf32> to vector<16x128xbf16>
    %c0_2 = arith.constant 0 : index
    %c0_3 = arith.constant 0 : index
    %5 = vector.load %arg3[%c0_2, %c0_3] : memref<128x128xbf16, #tpu.memory_space<vmem>>, vector<128x128xbf16>
    %cst = arith.constant dense<0.000000e+00> : vector<16x128xf32>
    %6 = tpu.matmul %4, %5, %cst {dimension_numbers = #tpu.dot_dimension_numbers<[1], [0], [0], [1], [0, 0, 1, 1], [], []>} : vector<16x128xbf16>, vector<128x128xbf16>, vector<16x128xf32> -> vector<16x128xf32>
    %c0_4 = arith.constant 0 : index
    %c0_5 = arith.constant 0 : index
    %7 = vector.load %arg4[%c0_4, %c0_5] : memref<1x128xf32, #tpu.memory_space<vmem>>, vector<1x128xf32>
    %8 = vector.broadcast %7 : vector<1x128xf32> to vector<16x128xf32>
    %9 = arith.addf %6, %8 : vector<16x128xf32>
    %10 = arith.negf %9 : vector<16x128xf32>
    %11 = math.exp %10 : vector<16x128xf32>
    %cst_6 = arith.constant 1.000000e+00 : f32
    %12 = vector.broadcast %cst_6 : f32 to vector<16x128xf32>
    %13 = arith.addf %12, %11 : vector<16x128xf32>
    %14 = arith.divf %12, %13 : vector<16x128xf32>
    %c0_7 = arith.constant 0 : index
    %c0_8 = arith.constant 0 : index
    %15 = vector.load %arg8[%c0_7, %c0_8] : memref<16x128xf32, #tpu.memory_space<vmem>>, vector<16x128xf32>
    %16 = arith.truncf %14 : vector<16x128xf32> to vector<16x128xbf16>
    %c0_9 = arith.constant 0 : index
    %c0_10 = arith.constant 0 : index
    %17 = vector.load %arg5[%c0_9, %c0_10] : memref<128x128xbf16, #tpu.memory_space<vmem>>, vector<128x128xbf16>
    %cst_11 = arith.constant dense<0.000000e+00> : vector<16x128xf32>
    %18 = tpu.matmul %16, %17, %cst_11 {dimension_numbers = #tpu.dot_dimension_numbers<[1], [0], [0], [1], [0, 0, 1, 1], [], []>} : vector<16x128xbf16>, vector<128x128xbf16>, vector<16x128xf32> -> vector<16x128xf32>
    %19 = arith.addf %15, %18 : vector<16x128xf32>
    %c0_12 = arith.constant 0 : index
    %c0_13 = arith.constant 0 : index
    %20 = vector.load %arg8[%c0_12, %c0_13] : memref<16x128xf32, #tpu.memory_space<vmem>>, vector<16x128xf32>
    tpu.vector_store %arg8[%c0_12, %c0_13], %19 {strides = array<i32>} : memref<16x128xf32, #tpu.memory_space<vmem>>, vector<16x128xf32>,
    %c0_i32_14 = arith.constant 0 : i32
    %21 = arith.cmpi eq, %arg1, %c0_i32_14 : i32
    %22 = arith.extui %21 : i1 to i32
    %c0_i32_15 = arith.constant 0 : i32
    %23 = arith.cmpi ne, %22, %c0_i32_15 : i32
    scf.if %23 {
      %c0_16 = arith.constant 0 : index
      %c0_17 = arith.constant 0 : index
      %24 = vector.load %arg8[%c0_16, %c0_17] : memref<16x128xf32, #tpu.memory_space<vmem>>, vector<16x128xf32>
      %c0_18 = arith.constant 0 : index
      %c0_19 = arith.constant 0 : index
      %25 = vector.load %arg6[%c0_18, %c0_19] : memref<1x128xf32, #tpu.memory_space<vmem>>, vector<1x128xf32>
      %26 = vector.broadcast %25 : vector<1x128xf32> to vector<16x128xf32>
      %27 = arith.addf %24, %26 : vector<16x128xf32>
      %c0_20 = arith.constant 0 : index
      %c0_21 = arith.constant 0 : index
      %28 = vector.load %arg7[%c0_20, %c0_21] : memref<16x128xf32, #tpu.memory_space<vmem>>, vector<16x128xf32>
      tpu.vector_store %arg7[%c0_20, %c0_21], %27 {strides = array<i32>} : memref<16x128xf32, #tpu.memory_space<vmem>>, vector<16x128xf32>,
    } else {
    }
    return
  }
  func.func @transform_0(%arg0: i32, %arg1: i32) -> (i32, i32) {
    %c0_i32 = arith.constant 0 : i32
    %c0_i32_0 = arith.constant 0 : i32
    return %arg0, %c0_i32 : i32, i32
  }
  func.func @transform_1(%arg0: i32, %arg1: i32) -> (i32, i32) {
    %c0_i32 = arith.constant 0 : i32
    %c0_i32_0 = arith.constant 0 : i32
    return %c0_i32, %arg1 : i32, i32
  }
  func.func @transform_2(%arg0: i32, %arg1: i32) -> (i32, i32) {
    %c0_i32 = arith.constant 0 : i32
    %c0_i32_0 = arith.constant 0 : i32
    return %c0_i32, %arg1 : i32, i32
  }
  func.func @transform_3(%arg0: i32, %arg1: i32) -> (i32, i32) {
    %c0_i32 = arith.constant 0 : i32
    %c0_i32_0 = arith.constant 0 : i32
    return %arg1, %c0_i32 : i32, i32
  }
  func.func @transform_4(%arg0: i32, %arg1: i32) -> (i32, i32) {
    %c0_i32 = arith.constant 0 : i32
    %c0_i32_0 = arith.constant 0 : i32
    %c0_i32_1 = arith.constant 0 : i32
    return %c0_i32, %c0_i32_0 : i32, i32
  }
  func.func @transform_5(%arg0: i32, %arg1: i32) -> (i32, i32) {
    %c0_i32 = arith.constant 0 : i32
    %c0_i32_0 = arith.constant 0 : i32
    return %arg0, %c0_i32 : i32, i32
  }
}

</mosaic_0001>

<bundles_post_ra>
// kernel: _ffn_forward.1
= control target key start
LH: loop header
LB: loop body
LE: loop exit
PB: predicated region body
PF: predicated region fallthrough
CT: control target
= control target key end

     0   :  { %10 = vsyncpa [#allocation4], 0  ;;  %s550_s0 = inlined_call_operand.vmem [shape: f32[16,128], index: 0, kind: input, shape index: {}]   ;;  %s551_s1 = inlined_call_operand.hbm [shape: bf16[128,128], index: 1, kind: input, shape index: {}]   ;;  %s552_s2 = inlined_call_operand.vmem [shape: f32[1,128], index: 2, kind: input, shape index: {}]   ;;  %s553_s3 = inlined_call_operand.hbm [shape: bf16[128,128], index: 3, kind: input, shape index: {}]   ;;  %s554_s4 = inlined_call_operand.vmem [shape: f32[1,128], index: 4, kind: input, shape index: {}]   ;;  %s555_s5 = inlined_call_operand.vmem [shape: f32[16,128], index: 5, kind: output, shape index: {}]  }
   0x1   :  { %11 = vsyncpa [#allocation6], 0  ;;  %s472_s18 = smov [#allocation3]   ;;  %s424_s22 = scalar_lea.hbm %s551_s1, 1024 }
   0x2   :  { %s19_s19 = sshll.u32 %s472_s18, 4  ;;  %p425_p0 = scmp.ne.s32.totalorder %s551_s1, %s424_s22  ;;  %s20_s19 = int_to_ptr.vmem [resolvable:$true] %s19_s19 }
   0x3   :  { %p428_p1 = scmp.lt.u32.totalorder %s424_s22, %s551_s1 }
   0x5   :  { %p430_p2 = pnand %p428_p1, %p425_p0 }
   0x7   :  { %433 = shalt.err (!%p430_p2)
}
   0x8   :  { %s434_s27 = scalar_lea.vmem %s20_s19, 1024  ;;  %p439_p4 = scmp.lt.s32.totalorder %s20_s19, %s20_s19 }
   0x9   :  { %p435_p3 = scmp.ne.s32.totalorder %s20_s19, %s434_s27  ;;  %p440_p5 = scmp.lt.s32.totalorder %s434_s27, %s434_s27 }
   0xb   :  { %p441_p6 = por %p440_p5, %p439_p4 }
   0xd   :  { %p442_p7 = pnand %p441_p6, %p435_p3 }
   0xf   :  { %445 = shalt.err (!%p442_p7)
}
  0x10   :  { %s473_s28 = smov 64   ;;  %s474_s29 = smov 4  }
  0x11   :  { %25 = dma.hbm_to_vmem [thread:$0]  %s551_s1, 1024, %s20_s19, [#allocation4], %s473_s28, %s473_s28, %s474_s29  }
  0x12   :  { %s475_s7 = smov [#allocation5]   ;;  %s446_s11 = scalar_lea.hbm %s553_s3, 1024 }
  0x13   :  { %s33_s8 = sshll.u32 %s475_s7, 4  ;;  %p447_p8 = scmp.ne.s32.totalorder %s553_s3, %s446_s11  ;;  %s34_s8 = int_to_ptr.vmem [resolvable:$true] %s33_s8 }
  0x14   :  { %p450_p9 = scmp.lt.u32.totalorder %s446_s11, %s553_s3 }
  0x16   :  { %p452_p10 = pnand %p450_p9, %p447_p8 }
  0x18   :  { %455 = shalt.err (!%p452_p10)
}
  0x19   :  { %s456_s16 = scalar_lea.vmem %s34_s8, 1024  ;;  %p461_p12 = scmp.lt.s32.totalorder %s34_s8, %s34_s8 }
  0x1a   :  { %p457_p11 = scmp.ne.s32.totalorder %s34_s8, %s456_s16  ;;  %p462_p13 = scmp.lt.s32.totalorder %s456_s16, %s456_s16 }
  0x1c   :  { %p463_p0 = por %p462_p13, %p461_p12 }
  0x1e   :  { %p464_p1 = pnand %p463_p0, %p457_p11 }
  0x20   :  { %467 = shalt.err (!%p464_p1)
}
  0x21   :  { %39 = dma.hbm_to_vmem [thread:$0]  %s553_s3, 1024, %s34_s8, [#allocation6], %s473_s28, %s473_s28, %s474_s29  }
  0x22   :  { %468 = dma.done.wait [#allocation4], 1024  }
  0x23   :  { %469 = vsyncadd [#allocation4], 4294966272 }
  0x24   :  { %470 = dma.done.wait [#allocation6], 1024  }
  0x25   :  { %471 = vsyncadd [#allocation6], 4294966272  ;;  %v476_v0 = vmov 0.0   ;;  %vm477_vm0 = vmmov 0   ;;  %v400_v1 = vld [vmem:[#allocation3] sm:$0xff]   ;;  %v401_v2 = vld [vmem:[#allocation3 + $0x8] sm:$0xff]  }
  0x26   :  { %354 = vmatprep.subr.bf16.mxu0 %v476_v0  ;;  %370 = vmatprep.mubr.msk.bf16.mxu0 %vm477_vm0, %v476_v0  ;;  %v402_v3 = vld [vmem:[#allocation3 + $0x10] sm:$0xff]   ;;  %v403_v4 = vld [vmem:[#allocation3 + $0x18] sm:$0xff]   ;;  %v404_v5 = vld [vmem:[#allocation3 + $0x20] sm:$0xff]  }
  0x27   :  { %374 = vmatprep.subr.bf16.mxu1 %v476_v0  ;;  %390 = vmatprep.mubr.msk.bf16.mxu1 %vm477_vm0, %v476_v0  ;;  %v405_v6 = vld [vmem:[#allocation3 + $0x28] sm:$0xff]   ;;  %v406_v7 = vld [vmem:[#allocation3 + $0x30] sm:$0xff]   ;;  %v407_v8 = vld [vmem:[#allocation3 + $0x38] sm:$0xff]  }
  0x28   :  { %355 = vmatpush3.bf16.msra.mxu0 %v400_v1  ;;  %v55_v9 = vld [vmem:[%s550_s0] sm:$0xff]  ;;  %v56_v10 = vld [vmem:[%s550_s0 + $0x8] sm:$0xff]  ;;  %v410_v14 = vld [vmem:[#allocation5 + $0x10] sm:$0xff]  }
  0x29   :  { %356 = vmatprep.subr.bf16.mxu0 %v476_v0  ;;  %v57_v11 = vpack.c.bf16 %v56_v10, %v55_v9  ;;  %v408_v12 = vld [vmem:[#allocation5] sm:$0xff]   ;;  %v409_v13 = vld [vmem:[#allocation5 + $0x8] sm:$0xff]   ;;  %v411_v15 = vld [vmem:[#allocation5 + $0x18] sm:$0xff]  }
  0x2a   :  { %375 = vmatpush3.bf16.msra.mxu1 %v408_v12  ;;  %v412_v16 = vld [vmem:[#allocation5 + $0x20] sm:$0xff]   ;;  %v413_v17 = vld [vmem:[#allocation5 + $0x28] sm:$0xff]   ;;  %v414_v18 = vld [vmem:[#allocation5 + $0x30] sm:$0xff]  }
  0x2b   :  { %376 = vmatprep.subr.bf16.mxu1 %v476_v0  ;;  %v415_v19 = vld [vmem:[#allocation5 + $0x38] sm:$0xff]   ;;  %v316_v20 = vld [vmem:[%s552_s2] ss:$0 sm:$0xff] }
  0x2c   :  { %357 = vmatpush3.bf16.msra.mxu0 %v401_v2  ;;  %v335_v36 = vld [vmem:[%s554_s4] ss:$0 sm:$0xff] }
  0x2d   :  { %358 = vmatprep.subr.bf16.mxu0 %v476_v0 }
  0x2e   :  { %377 = vmatpush3.bf16.msra.mxu1 %v409_v13 }
  0x2f   :  { %378 = vmatprep.subr.bf16.mxu1 %v476_v0 }
  0x30   :  { %359 = vmatpush3.bf16.msra.mxu0 %v402_v3 }
  0x31   :  { %360 = vmatprep.subr.bf16.mxu0 %v476_v0 }
  0x32   :  { %379 = vmatpush3.bf16.msra.mxu1 %v410_v14 }
  0x33   :  { %380 = vmatprep.subr.bf16.mxu1 %v476_v0 }
  0x34   :  { %361 = vmatpush3.bf16.msra.mxu0 %v403_v4 }
  0x35   :  { %362 = vmatprep.subr.bf16.mxu0 %v476_v0 }
  0x36   :  { %381 = vmatpush3.bf16.msra.mxu1 %v411_v15 }
  0x37   :  { %382 = vmatprep.subr.bf16.mxu1 %v476_v0 }
  0x38   :  { %363 = vmatpush3.bf16.msra.mxu0 %v404_v5 }
  0x39   :  { %364 = vmatprep.subr.bf16.mxu0 %v476_v0 }
  0x3a   :  { %383 = vmatpush3.bf16.msra.mxu1 %v412_v16 }
  0x3b   :  { %384 = vmatprep.subr.bf16.mxu1 %v476_v0 }
  0x3c   :  { %365 = vmatpush3.bf16.msra.mxu0 %v405_v6 }
  0x3d   :  { %366 = vmatprep.subr.bf16.mxu0 %v476_v0 }
  0x3e   :  { %385 = vmatpush3.bf16.msra.mxu1 %v413_v17 }
  0x3f   :  { %386 = vmatprep.subr.bf16.mxu1 %v476_v0 }
  0x40   :  { %367 = vmatpush3.bf16.msra.mxu0 %v406_v7 }
  0x41   :  { %368 = vmatprep.subr.bf16.mxu0 %v476_v0 }
  0x42   :  { %387 = vmatpush3.bf16.msra.mxu1 %v414_v18 }
  0x43   :  { %388 = vmatprep.subr.bf16.mxu1 %v476_v0 }
  0x44   :  { %369 = vmatpush3.bf16.msra.mxu0 %v407_v8 }
  0x46   :  { %389 = vmatpush3.bf16.msra.mxu1 %v415_v19 }
  0x47   :  { %371 = vmatmul.mubr.bf16.vlgmr.msra.gmra.mrb[0].mxu0 %v57_v11 }
 0x11a   :  { %v163_v21 = vpop.f32.mrb[0].mxu0 }
 0x11b   :  { %v164_v22 = vadd.f32 %v316_v20, %v163_v21  ;;  %v372_v23 = vpop.f32.mrb[1].mxu0 }
 0x11c   :  { %v166_v24 = vpop.f32.mrb[2].mxu0 }
 0x11d   :  { %v325_v25 = vmul.f32 -1.442695, %v164_v22  ;;  %v167_v26 = vadd.f32 %v316_v20, %v166_v24  ;;  %v373_v27 = vpop.f32.mrb[3].mxu0 }
 0x11f   :  { %416 = vpow2.f32 %v325_v25  ;;  %v326_v28 = vmul.f32 -1.442695, %v167_v26 }
 0x121   :  { %418 = vpow2.f32 %v326_v28 }
 0x129   :  { %v417_v29 = vpop.eup %416 }
 0x12a   :  { %v176_v30 = vadd.f32 1.0, %v417_v29 }
 0x12b   :  { %v419_v31 = vpop.eup %418 }
 0x12c   :  { %v177_v32 = vadd.f32 1.0, %v419_v31  ;;  %420 = vrcp.f32 %v176_v30 }
 0x12e   :  { %422 = vrcp.f32 %v177_v32 }
 0x136   :  { %v421_v33 = vpop.eup %420 }
 0x138   :  { %v423_v34 = vpop.eup %422 }
 0x139   :  { %v184_v35 = vpack.c.bf16 %v423_v34, %v421_v33 }
 0x13b   :  { %391 = vmatmul.mubr.bf16.vlgmr.msra.gmra.mrb[0].mxu1 %v184_v35 }
 0x20e   :  { %v283_v37 = vpop.f32.mrb[0].mxu1 }
 0x20f   :  { %v306_v38 = vadd.f32 %v335_v36, %v283_v37  ;;  %v392_v39 = vpop.f32.mrb[1].mxu1 }
 0x210   :  { %v286_v40 = vpop.f32.mrb[2].mxu1 }
 0x211   :  { %308 = vst [vmem:[%s555_s5] sm:$0xff] %v306_v38  ;;  %v307_v41 = vadd.f32 %v335_v36, %v286_v40  ;;  %v393_v42 = vpop.f32.mrb[3].mxu1 }
 0x213   :  { %309 = vst [vmem:[%s555_s5 + $0x8] sm:$0xff] %v307_v41 }
 0x214   :  { %314 = vsyncpa [#allocation4], 1 }
 0x215   :  { %315 = vsyncpa [#allocation6], 1 }

</bundles_post_ra>
